<compile_context>
chip_gen: v7x
topology: tpu7x:2x2x1
jax: 0.10.0
libtpu: 0.0.40
codegen_flags: <defaults>
</compile_context>

<pallas_src>
import functools
from typing import NamedTuple

import jax
import jax.numpy as jnp
import numpy as np
from jax.experimental import pallas as pl
from jax.experimental.pallas import tpu as pltpu

NEG_SLOPE = 0.01  # nn.LeakyReLU default negative_slope


def _leaky(v):
    return jnp.where(v >= 0, v, NEG_SLOPE * v)


class Layout(NamedTuple):
    """Static (hashable) slab layout: python ints only -> static in-kernel slices."""
    cin_flat: int   # C*H*W
    l1: int         # conv-1 output lanes = H*Wo1*F1
    l2: int         # conv-2 output lanes = F2*H*Wo2 (torch-flatten order)
    n_branch: int   # branch feature count
    d_hid: int      # ffn hidden dim
    d_out: int      # output dim
    r_w2: int       # row offset of conv-2 Toeplitz block in w_conv
    r_f1b: int      # row offset of branch part of ffn-input weight in w_ffn
    r_f2: int       # row offset of ffn-hidden weight in w_ffn
    r_o: int        # row offset of output weight in w_ffn


# ----------------------------------------------------------------------------
# Single fused Pallas kernel: whole CNN_NET forward (6 matmuls, 5 bias adds)
# ----------------------------------------------------------------------------
def _fused_cnn_net_kernel(x_ref, br_ref, wc_ref, wf_ref, bs_ref, out_ref, *, lo):
    f32 = jnp.float32
    x = x_ref[...]                               # (N, C*H*W) = (N, 60)
    br = br_ref[...]                             # (N, B)     = (N, 5)

    # conv input layer: Conv2d(C, F1, (1,k1)) + LeakyReLU  (block-Toeplitz matmul)
    y1 = jnp.dot(x, wc_ref[0:lo.cin_flat, 0:lo.l1], preferred_element_type=f32)
    y1 = _leaky(y1 + bs_ref[0:1, 0:lo.l1])       # (N, 192), lanes = (h, wo1, f1)

    # conv hidden layer: Conv2d(F1, F2, (1,k2)) + LeakyReLU
    y2 = jnp.dot(y1, wc_ref[lo.r_w2:lo.r_w2 + lo.l1, 0:lo.l2],
                 preferred_element_type=f32)
    y2 = _leaky(y2 + bs_ref[1:2, 0:lo.l2])       # (N, 24), lanes = torch flatten (f2, h, wo2)

    # ffn input layer: Linear(24 + B, D) + LeakyReLU
    # torch flatten + branch concat folded into two accumulating matmuls.
    h1 = (jnp.dot(y2, wf_ref[0:lo.l2, 0:lo.d_hid], preferred_element_type=f32)
          + jnp.dot(br, wf_ref[lo.r_f1b:lo.r_f1b + lo.n_branch, 0:lo.d_hid],
                    preferred_element_type=f32)
          + bs_ref[2:3, 0:lo.d_hid])
    h1 = _leaky(h1)                              # (N, D)

    # ffn hidden layer: Linear(D, D) + LeakyReLU   (num_ffn_layers = 1)
    h2 = jnp.dot(h1, wf_ref[lo.r_f2:lo.r_f2 + lo.d_hid, 0:lo.d_hid],
                 preferred_element_type=f32)
    h2 = _leaky(h2 + bs_ref[3:4, 0:lo.d_hid])    # (N, D)

    # linear output layer
    out = jnp.dot(h2, wf_ref[lo.r_o:lo.r_o + lo.d_hid, 0:lo.d_out],
                  preferred_element_type=f32) + bs_ref[4:5, 0:lo.d_out]
    out_ref[...] = out.astype(out_ref.dtype)


# ----------------------------------------------------------------------------
# One-time parameter preparation (outside the hot path)
# ----------------------------------------------------------------------------
def _up8(v):
    return (v + 7) // 8 * 8


def prepare_params(params, *, c, h, w):
    """Fold im2col, torch-flatten ordering and transposes into 3 packed f32 slabs."""
    w1 = np.asarray(params["w1"], np.float32)    # (F1, C, 1, k1)  torch OIHW
    b1 = np.asarray(params["b1"], np.float32)
    w2 = np.asarray(params["w2"], np.float32)    # (F2, F1, 1, k2)
    b2 = np.asarray(params["b2"], np.float32)
    wf1 = np.asarray(params["wf1"], np.float32)  # (D, F2*H*Wo2 + B)
    bf1 = np.asarray(params["bf1"], np.float32)
    wf2 = np.asarray(params["wf2"], np.float32)  # (D, D)
    bf2 = np.asarray(params["bf2"], np.float32)
    wo = np.asarray(params["wo"], np.float32)    # (d_out, D)
    bo = np.asarray(params["bo"], np.float32)

    f1, _, _, k1 = w1.shape
    f2, _, _, k2 = w2.shape
    wo1 = w - k1 + 1
    wo2 = wo1 - k2 + 1
    d_hid = wf1.shape[0]
    d_out = wo.shape[0]
    n_conv_feat = f2 * h * wo2
    n_branch = wf1.shape[1] - n_conv_feat

    cin_flat = c * h * w
    l1 = h * wo1 * f1              # conv-1 output lanes, order (h, wo1, f1)
    l2 = f2 * h * wo2              # conv-2 output lanes == torch flatten (f2, h, wo2)

    # conv-1 block-Toeplitz: x_flat(n, c*h*w) @ W1 -> y1(n, (h,wo1,f1))
    W1 = np.zeros((cin_flat, l1), np.float32)
    b1_row = np.tile(b1, h * wo1)
    for hh in range(h):
        for woi in range(wo1):
            for ff in range(f1):
                col = (hh * wo1 + woi) * f1 + ff
                for cc in range(c):
                    for kw in range(k1):
                        row = cc * h * w + hh * w + (woi + kw)
                        W1[row, col] = w1[ff, cc, 0, kw]

    # conv-2 block-Toeplitz: y1 @ W2 -> y2(n, torch-flatten (f2,h,wo2))
    W2 = np.zeros((l1, l2), np.float32)
    b2_row = np.zeros((l2,), np.float32)
    for f2i in range(f2):
        for hh in range(h):
            for w2i in range(wo2):
                col = f2i * h * wo2 + hh * wo2 + w2i
                b2_row[col] = b2[f2i]
                for f1i in range(f1):
                    for kw in range(k2):
                        row = (hh * wo1 + (w2i + kw)) * f1 + f1i
                        W2[row, col] = w2[f2i, f1i, 0, kw]

    # FFN weights (pre-transposed)
    wf1c = wf1[:, :n_conv_feat].T      # (l2, D)
    wf1b = wf1[:, n_conv_feat:].T      # (B, D)
    wf2t = wf2.T                       # (D, D)
    wot = wo.T                         # (D, d_out)

    # pack conv weights: one slab, 8-aligned row offsets
    r_w2 = _up8(cin_flat)
    width_conv = max(l1, l2)
    w_conv = np.zeros((_up8(r_w2 + l1), width_conv), np.float32)
    w_conv[0:cin_flat, 0:l1] = W1
    w_conv[r_w2:r_w2 + l1, 0:l2] = W2

    # pack FFN + output weights: one slab, 8-aligned row offsets
    r_f1b = _up8(l2)
    r_f2 = _up8(r_f1b + n_branch)
    r_o = _up8(r_f2 + d_hid)
    width_ffn = max(d_hid, d_out)
    w_ffn = np.zeros((_up8(r_o + d_hid), width_ffn), np.float32)
    w_ffn[0:l2, 0:d_hid] = wf1c
    w_ffn[r_f1b:r_f1b + n_branch, 0:d_hid] = wf1b
    w_ffn[r_f2:r_f2 + d_hid, 0:d_hid] = wf2t
    w_ffn[r_o:r_o + d_hid, 0:d_out] = wot

    # pack biases: one (8, width) slab, one row per layer
    width_b = max(l1, l2, d_hid, d_out)
    b_slab = np.zeros((8, width_b), np.float32)
    b_slab[0, 0:l1] = b1_row
    b_slab[1, 0:l2] = b2_row
    b_slab[2, 0:d_hid] = bf1
    b_slab[3, 0:d_hid] = bf2
    b_slab[4, 0:d_out] = bo

    slabs = {
        "w_conv": jnp.asarray(w_conv),
        "w_ffn": jnp.asarray(w_ffn),
        "b_slab": jnp.asarray(b_slab),
    }
    layout = Layout(cin_flat=cin_flat, l1=l1, l2=l2, n_branch=n_branch,
                    d_hid=d_hid, d_out=d_out, r_w2=r_w2, r_f1b=r_f1b,
                    r_f2=r_f2, r_o=r_o)
    return slabs, layout


# ----------------------------------------------------------------------------
# Forward wrapper: one pallas_call for the whole network
# ----------------------------------------------------------------------------
@functools.partial(jax.jit, static_argnames=("layout",))
def cnn_net_forward(slabs, layout, main_inputs, branch_inputs):
    n = main_inputs.shape[0]
    # rows = N, lanes = (c, h, w): a free contiguous reshape -- no XLA transpose.
    x_flat = main_inputs.astype(jnp.float32).reshape(n, -1)
    branch = branch_inputs.astype(jnp.float32)

    args = (x_flat, branch, slabs["w_conv"], slabs["w_ffn"], slabs["b_slab"])
    kernel = functools.partial(_fused_cnn_net_kernel, lo=layout)

    def full_block(a):
        nd = a.ndim
        return pl.BlockSpec(a.shape, lambda i, _nd=nd: (0,) * _nd)

    # grid=(1,): the whole working set is well under 1 MB, so a single grid
    # step with full-array blocks is optimal.  For large batches: tile rows
    # (multiples of 8), keep weight slabs with constant index_map, mark the
    # batch axis "parallel" (v7x megacore) and size tiles for 64 MiB VMEM.
    return pl.pallas_call(
        kernel,
        out_shape=jax.ShapeDtypeStruct((n, layout.d_out), jnp.float32),
        grid=(1,),
        in_specs=[full_block(a) for a in args],
        out_specs=pl.BlockSpec((n, layout.d_out), lambda i: (0, 0)),
        compiler_params=pltpu.CompilerParams(
            dimension_semantics=("arbitrary",)),
    )(*args)


# ----------------------------------------------------------------------------
# Pure-JAX reference (true f32, for correctness check)
# ----------------------------------------------------------------------------
def reference_forward(params, main_inputs, branch_inputs):
    hp = jax.lax.Precision.HIGHEST
    y = jax.lax.conv_general_dilated(
        main_inputs, params["w1"], (1, 1), "VALID",
        dimension_numbers=("NCHW", "OIHW", "NCHW"), precision=hp)
    y = _leaky(y + params["b1"][None, :, None, None])
    y = jax.lax.conv_general_dilated(
        y, params["w2"], (1, 1), "VALID",
        dimension_numbers=("NCHW", "OIHW", "NCHW"), precision=hp)
    y = _leaky(y + params["b2"][None, :, None, None])
    flat = y.reshape(y.shape[0], -1)                       # torch flatten (C,H,W)
    latent = jnp.concatenate([flat, branch_inputs], axis=-1)
    latent = _leaky(jnp.dot(latent, params["wf1"].T, precision=hp) + params["bf1"])
    latent = _leaky(jnp.dot(latent, params["wf2"].T, precision=hp) + params["bf2"])
    return jnp.dot(latent, params["wo"].T, precision=hp) + params["bo"]


# ----------------------------------------------------------------------------
# Deterministic parameter init + run
# ----------------------------------------------------------------------------
def make_params(key, *, c_in, h, dim_filter, dim_branch, dim_hidden, dim_output, k1, k2):
    ks = jax.random.split(key, 10)
    num_branch_features = dim_filter * h + dim_branch
    return {
        "w1": 0.1 * jax.random.normal(ks[0], (dim_filter, c_in, 1, k1), jnp.float32),
        "b1": 0.1 * jax.random.normal(ks[1], (dim_filter,), jnp.float32),
        "w2": 0.1 * jax.random.normal(ks[2], (dim_filter, dim_filter, 1, k2), jnp.float32),
        "b2": 0.1 * jax.random.normal(ks[3], (dim_filter,), jnp.float32),
        "wf1": 0.1 * jax.random.normal(ks[4], (dim_hidden, num_branch_features), jnp.float32),
        "bf1": 0.1 * jax.random.normal(ks[5], (dim_hidden,), jnp.float32),
        "wf2": 0.1 * jax.random.normal(ks[6], (dim_hidden, dim_hidden), jnp.float32),
        "bf2": 0.1 * jax.random.normal(ks[7], (dim_hidden,), jnp.float32),
        "wo": 0.1 * jax.random.normal(ks[8], (dim_output, dim_hidden), jnp.float32),
        "bo": 0.1 * jax.random.normal(ks[9], (dim_output,), jnp.float32),
    }


if __name__ == "__main__":
    # Module hyper-params (small, consistent with the forward-pass constraints)
    N = 2
    C, H, W = 4, 3, 15          # dim_input
    DIM_BRANCH = 5              # dim_branch[0]
    DIM_OUTPUT = 6
    DIM_FILTER = 8
    DIM_HIDDEN = 32
    NUM_CNN_LAYERS = 1

    # Replicate the kernel-size logic from CNN_NET.__init__
    kernalsize = (W + NUM_CNN_LAYERS) // (NUM_CNN_LAYERS + 1)
    assert kernalsize > 1
    kernaldelta = W - (NUM_CNN_LAYERS + 1) * kernalsize
    if kernaldelta > 0:
        k1 = kernalsize + 1
        kernaldelta -= 1
    else:
        k1 = kernalsize
    if kernaldelta > 0:
        k2 = kernalsize + 1
    else:
        k2 = kernalsize

    root = jax.random.PRNGKey(0)
    k_param, k_main, k_branch = jax.random.split(root, 3)
    params = make_params(
        k_param, c_in=C, h=H, dim_filter=DIM_FILTER, dim_branch=DIM_BRANCH,
        dim_hidden=DIM_HIDDEN, dim_output=DIM_OUTPUT, k1=k1, k2=k2)

    # One-time weight transforms (outside the hot path): 3 packed slabs.
    slabs, layout = prepare_params(params, c=C, h=H, w=W)

    main_inputs = jax.random.normal(k_main, (N, C, H, W), jnp.float32)
    branch_inputs = jax.random.normal(k_branch, (N, DIM_BRANCH), jnp.float32)

    out = jax.block_until_ready(cnn_net_forward(slabs, layout, main_inputs, branch_inputs))
    ref = jax.block_until_ready(reference_forward(params, main_inputs, branch_inputs))

    # Tolerance allows default (bf16-pass) MXU matmul precision vs. the f32
    # HIGHEST-precision reference; semantic errors would be ~10-100x larger.
    np.testing.assert_allclose(np.asarray(out), np.asarray(ref), rtol=2e-2, atol=2e-2)
    assert out.shape == (N, DIM_OUTPUT)

    print("KERNEL_OK")
</pallas_src>

<mosaic_0001>
module attributes {stable_mosaic.version = 11 : i64} {
  func.func @_fused_cnn_net_kernel(%arg0: i32, %arg1: memref<2x180xf32, #tpu.memory_space<vmem>>, %arg2: memref<2x5xf32, #tpu.memory_space<vmem>>, %arg3: memref<376x192xf32, #tpu.memory_space<vmem>>, %arg4: memref<96x32xf32, #tpu.memory_space<vmem>>, %arg5: memref<8x192xf32, #tpu.memory_space<vmem>>, %arg6: memref<2x6xf32, #tpu.memory_space<vmem>>) attributes {dimension_semantics = [#tpu.dimension_semantics<arbitrary>], iteration_bounds = array<i64: 1>, scalar_prefetch = 0 : i64, scratch_operands = 0 : i64, tpu.core_type = #tpu.core_type<tc>, window_params = [{pipeline_mode = #tpu.pipeline_mode<synchronous>, transform_indices = @transform_0, window_bounds = array<i64: 2, 180>}, {pipeline_mode = #tpu.pipeline_mode<synchronous>, transform_indices = @transform_1, window_bounds = array<i64: 2, 5>}, {pipeline_mode = #tpu.pipeline_mode<synchronous>, transform_indices = @transform_2, window_bounds = array<i64: 376, 192>}, {pipeline_mode = #tpu.pipeline_mode<synchronous>, transform_indices = @transform_3, window_bounds = array<i64: 96, 32>}, {pipeline_mode = #tpu.pipeline_mode<synchronous>, transform_indices = @transform_4, window_bounds = array<i64: 8, 192>}, {pipeline_mode = #tpu.pipeline_mode<synchronous>, transform_indices = @transform_5, window_bounds = array<i64: 2, 6>}]} {
    %c0 = arith.constant 0 : index
    %c0_0 = arith.constant 0 : index
    %0 = vector.load %arg1[%c0, %c0_0] : memref<2x180xf32, #tpu.memory_space<vmem>>, vector<2x180xf32>
    %c0_1 = arith.constant 0 : index
    %c0_2 = arith.constant 0 : index
    %1 = vector.load %arg2[%c0_1, %c0_2] : memref<2x5xf32, #tpu.memory_space<vmem>>, vector<2x5xf32>
    %c0_3 = arith.constant 0 : index
    %c0_4 = arith.constant 0 : index
    %2 = vector.load %arg3[%c0_3, %c0_4] : memref<376x192xf32, #tpu.memory_space<vmem>>, vector<180x192xf32>
    %cst = arith.constant dense<0.000000e+00> : vector<2x192xf32>
    %3 = tpu.matmul %0, %2, %cst {dimension_numbers = #tpu.dot_dimension_numbers<[1], [0], [0], [1], [0, 0, 1, 1], [], []>} : vector<2x180xf32>, vector<180x192xf32>, vector<2x192xf32> -> vector<2x192xf32>
    %c0_5 = arith.constant 0 : index
    %c0_6 = arith.constant 0 : index
    %4 = vector.load %arg5[%c0_5, %c0_6] : memref<8x192xf32, #tpu.memory_space<vmem>>, vector<1x192xf32>
    %5 = vector.broadcast %4 : vector<1x192xf32> to vector<2x192xf32>
    %6 = arith.addf %3, %5 : vector<2x192xf32>
    %cst_7 = arith.constant 0.000000e+00 : f32
    %7 = vector.broadcast %cst_7 : f32 to vector<2x192xf32>
    %8 = arith.cmpf oge, %6, %7 : vector<2x192xf32>
    %cst_8 = arith.constant 0.00999999977 : f32
    %9 = vector.broadcast %cst_8 : f32 to vector<2x192xf32>
    %10 = arith.mulf %9, %6 : vector<2x192xf32>
    %11 = arith.select %8, %6, %10 : vector<2x192xi1>, vector<2x192xf32>
    %c184 = arith.constant 184 : index
    %c0_9 = arith.constant 0 : index
    %12 = vector.load %arg3[%c184, %c0_9] : memref<376x192xf32, #tpu.memory_space<vmem>>, vector<192x24xf32>
    %cst_10 = arith.constant dense<0.000000e+00> : vector<2x24xf32>
    %13 = tpu.matmul %11, %12, %cst_10 {dimension_numbers = #tpu.dot_dimension_numbers<[1], [0], [0], [1], [0, 0, 1, 1], [], []>} : vector<2x192xf32>, vector<192x24xf32>, vector<2x24xf32> -> vector<2x24xf32>
    %c1 = arith.constant 1 : index
    %c0_11 = arith.constant 0 : index
    %14 = vector.load %arg5[%c1, %c0_11] : memref<8x192xf32, #tpu.memory_space<vmem>>, vector<1x24xf32>
    %15 = vector.broadcast %14 : vector<1x24xf32> to vector<2x24xf32>
    %16 = arith.addf %13, %15 : vector<2x24xf32>
    %cst_12 = arith.constant 0.000000e+00 : f32
    %17 = vector.broadcast %cst_12 : f32 to vector<2x24xf32>
    %18 = arith.cmpf oge, %16, %17 : vector<2x24xf32>
    %cst_13 = arith.constant 0.00999999977 : f32
    %19 = vector.broadcast %cst_13 : f32 to vector<2x24xf32>
    %20 = arith.mulf %19, %16 : vector<2x24xf32>
    %21 = arith.select %18, %16, %20 : vector<2x24xi1>, vector<2x24xf32>
    %c0_14 = arith.constant 0 : index
    %c0_15 = arith.constant 0 : index
    %22 = vector.load %arg4[%c0_14, %c0_15] : memref<96x32xf32, #tpu.memory_space<vmem>>, vector<24x32xf32>
    %cst_16 = arith.constant dense<0.000000e+00> : vector<2x32xf32>
    %23 = tpu.matmul %21, %22, %cst_16 {dimension_numbers = #tpu.dot_dimension_numbers<[1], [0], [0], [1], [0, 0, 1, 1], [], []>} : vector<2x24xf32>, vector<24x32xf32>, vector<2x32xf32> -> vector<2x32xf32>
    %c24 = arith.constant 24 : index
    %c0_17 = arith.constant 0 : index
    %24 = vector.load %arg4[%c24, %c0_17] : memref<96x32xf32, #tpu.memory_space<vmem>>, vector<5x32xf32>
    %cst_18 = arith.constant dense<0.000000e+00> : vector<2x32xf32>
    %25 = tpu.matmul %1, %24, %cst_18 {dimension_numbers = #tpu.dot_dimension_numbers<[1], [0], [0], [1], [0, 0, 1, 1], [], []>} : vector<2x5xf32>, vector<5x32xf32>, vector<2x32xf32> -> vector<2x32xf32>
    %26 = arith.addf %23, %25 : vector<2x32xf32>
    %c2 = arith.constant 2 : index
    %c0_19 = arith.constant 0 : index
    %27 = vector.load %arg5[%c2, %c0_19] : memref<8x192xf32, #tpu.memory_space<vmem>>, vector<1x32xf32>
    %28 = vector.broadcast %27 : vector<1x32xf32> to vector<2x32xf32>
    %29 = arith.addf %26, %28 : vector<2x32xf32>
    %cst_20 = arith.constant 0.000000e+00 : f32
    %30 = vector.broadcast %cst_20 : f32 to vector<2x32xf32>
    %31 = arith.cmpf oge, %29, %30 : vector<2x32xf32>
    %cst_21 = arith.constant 0.00999999977 : f32
    %32 = vector.broadcast %cst_21 : f32 to vector<2x32xf32>
    %33 = arith.mulf %32, %29 : vector<2x32xf32>
    %34 = arith.select %31, %29, %33 : vector<2x32xi1>, vector<2x32xf32>
    %c32 = arith.constant 32 : index
    %c0_22 = arith.constant 0 : index
    %35 = vector.load %arg4[%c32, %c0_22] : memref<96x32xf32, #tpu.memory_space<vmem>>, vector<32x32xf32>
    %cst_23 = arith.constant dense<0.000000e+00> : vector<2x32xf32>
    %36 = tpu.matmul %34, %35, %cst_23 {dimension_numbers = #tpu.dot_dimension_numbers<[1], [0], [0], [1], [0, 0, 1, 1], [], []>} : vector<2x32xf32>, vector<32x32xf32>, vector<2x32xf32> -> vector<2x32xf32>
    %c3 = arith.constant 3 : index
    %c0_24 = arith.constant 0 : index
    %37 = vector.load %arg5[%c3, %c0_24] : memref<8x192xf32, #tpu.memory_space<vmem>>, vector<1x32xf32>
    %38 = vector.broadcast %37 : vector<1x32xf32> to vector<2x32xf32>
    %39 = arith.addf %36, %38 : vector<2x32xf32>
    %cst_25 = arith.constant 0.000000e+00 : f32
    %40 = vector.broadcast %cst_25 : f32 to vector<2x32xf32>
    %41 = arith.cmpf oge, %39, %40 : vector<2x32xf32>
    %cst_26 = arith.constant 0.00999999977 : f32
    %42 = vector.broadcast %cst_26 : f32 to vector<2x32xf32>
    %43 = arith.mulf %42, %39 : vector<2x32xf32>
    %44 = arith.select %41, %39, %43 : vector<2x32xi1>, vector<2x32xf32>
    %c64 = arith.constant 64 : index
    %c0_27 = arith.constant 0 : index
    %45 = vector.load %arg4[%c64, %c0_27] : memref<96x32xf32, #tpu.memory_space<vmem>>, vector<32x6xf32>
    %cst_28 = arith.constant dense<0.000000e+00> : vector<2x6xf32>
    %46 = tpu.matmul %44, %45, %cst_28 {dimension_numbers = #tpu.dot_dimension_numbers<[1], [0], [0], [1], [0, 0, 1, 1], [], []>} : vector<2x32xf32>, vector<32x6xf32>, vector<2x6xf32> -> vector<2x6xf32>
    %c4 = arith.constant 4 : index
    %c0_29 = arith.constant 0 : index
    %47 = vector.load %arg5[%c4, %c0_29] : memref<8x192xf32, #tpu.memory_space<vmem>>, vector<1x6xf32>
    %48 = vector.broadcast %47 : vector<1x6xf32> to vector<2x6xf32>
    %49 = arith.addf %46, %48 : vector<2x6xf32>
    %c0_30 = arith.constant 0 : index
    %c0_31 = arith.constant 0 : index
    %50 = vector.load %arg6[%c0_30, %c0_31] : memref<2x6xf32, #tpu.memory_space<vmem>>, vector<2x6xf32>
    tpu.vector_store %arg6[%c0_30, %c0_31], %49 {strides = array<i32>} : memref<2x6xf32, #tpu.memory_space<vmem>>, vector<2x6xf32>,
    return
  }
  func.func @transform_0(%arg0: i32) -> (i32, i32) {
    %c0_i32 = arith.constant 0 : i32
    %c0_i32_0 = arith.constant 0 : i32
    %c0_i32_1 = arith.constant 0 : i32
    return %c0_i32, %c0_i32_0 : i32, i32
  }
  func.func @transform_1(%arg0: i32) -> (i32, i32) {
    %c0_i32 = arith.constant 0 : i32
    %c0_i32_0 = arith.constant 0 : i32
    %c0_i32_1 = arith.constant 0 : i32
    return %c0_i32, %c0_i32_0 : i32, i32
  }
  func.func @transform_2(%arg0: i32) -> (i32, i32) {
    %c0_i32 = arith.constant 0 : i32
    %c0_i32_0 = arith.constant 0 : i32
    %c0_i32_1 = arith.constant 0 : i32
    return %c0_i32, %c0_i32_0 : i32, i32
  }
  func.func @transform_3(%arg0: i32) -> (i32, i32) {
    %c0_i32 = arith.constant 0 : i32
    %c0_i32_0 = arith.constant 0 : i32
    %c0_i32_1 = arith.constant 0 : i32
    return %c0_i32, %c0_i32_0 : i32, i32
  }
  func.func @transform_4(%arg0: i32) -> (i32, i32) {
    %c0_i32 = arith.constant 0 : i32
    %c0_i32_0 = arith.constant 0 : i32
    %c0_i32_1 = arith.constant 0 : i32
    return %c0_i32, %c0_i32_0 : i32, i32
  }
  func.func @transform_5(%arg0: i32) -> (i32, i32) {
    %c0_i32 = arith.constant 0 : i32
    %c0_i32_0 = arith.constant 0 : i32
    %c0_i32_1 = arith.constant 0 : i32
    return %c0_i32, %c0_i32_0 : i32, i32
  }
}

</mosaic_0001>

<bundles_post_ra>
// kernel: cnn_net_forward.1
= control target key start
LH: loop header
LB: loop body
LE: loop exit
PB: predicated region body
PF: predicated region fallthrough
CT: control target
= control target key end

     0   :  { %v802_v7 = vmov 0.0|0.0   ;;  %vm91_vm0 = vcmask 424960   ;;  %s1141_s0 = inlined_call_operand.vmem [shape: f32[2,180], index: 0, kind: input, shape index: {}]   ;;  %s1142_s1 = inlined_call_operand.vmem [shape: f32[2,5], index: 1, kind: input, shape index: {}]   ;;  %s1143_s2 = inlined_call_operand.vmem [shape: f32[376,192], index: 2, kind: input, shape index: {}]   ;;  %s1144_s3 = inlined_call_operand.vmem [shape: f32[96,32], index: 3, kind: input, shape index: {}]   ;;  %s1145_s4 = inlined_call_operand.vmem [shape: f32[8,192], index: 4, kind: input, shape index: {}]   ;;  %s1146_s5 = inlined_call_operand.hbm [shape: f32[2,6], index: 5, kind: output, shape index: {}]  }
   0x1   :  { %v24_v0 = vld [vmem:[%s1143_s2 + $0x8] sm:$0xff]  ;;  %v26_v1 = vld [vmem:[%s1143_s2 + $0x18] sm:$0xff]  ;;  %v23_v2 = vld [vmem:[%s1143_s2] sm:$0xff]  ;;  %723 = vmatprep.subr.bf16.mxu1 %v802_v7 }
   0x2   :  { %v679_v3 = vpack.c.bf16 %v26_v1, %v24_v0  ;;  %v25_v4 = vld [vmem:[%s1143_s2 + $0x10] sm:$0xff]  ;;  %v28_v5 = vld [vmem:[%s1143_s2 + $0x28] sm:$0xff]  ;;  %v30_v6 = vld [vmem:[%s1143_s2 + $0x38] sm:$0xff] }
   0x3   :  { %v681_v8 = vpack.c.bf16 %v25_v4, %v23_v2  ;;  %v683_v9 = vpack.c.bf16 %v30_v6, %v28_v5  ;;  %v27_v10 = vld [vmem:[%s1143_s2 + $0x20] sm:$0xff]  ;;  %v29_v11 = vld [vmem:[%s1143_s2 + $0x30] sm:$0xff]  ;;  %v32_v12 = vld [vmem:[%s1143_s2 + $0x48] sm:$0xff] }
   0x4   :  { %680 = vmatprep.subr.bf16.mxu0 %v679_v3  ;;  %v34_v13 = vld [vmem:[%s1143_s2 + $0x58] sm:$0xff]  ;;  %v685_v14 = vpack.c.bf16 %v29_v11, %v27_v10  ;;  %v31_v16 = vld [vmem:[%s1143_s2 + $0x40] sm:$0xff]  ;;  %v33_v17 = vld [vmem:[%s1143_s2 + $0x50] sm:$0xff] }
   0x5   :  { %682 = vmatpush1.bf16.msra.mxu0 %v681_v8  ;;  %v687_v15 = vpack.c.bf16 %v34_v13, %v32_v12  ;;  %v36_v18 = vld [vmem:[%s1143_s2 + $0x68] sm:$0xff]  ;;  %v38_v19 = vld [vmem:[%s1143_s2 + $0x78] sm:$0xff]  ;;  %v689_v20 = vpack.c.bf16 %v33_v17, %v31_v16  ;;  %v35_v22 = vld [vmem:[%s1143_s2 + $0x60] sm:$0xff] }
   0x6   :  { %684 = vmatprep.subr.bf16.mxu0 %v683_v9  ;;  %v691_v21 = vpack.c.bf16 %v38_v19, %v36_v18  ;;  %v37_v23 = vld [vmem:[%s1143_s2 + $0x70] sm:$0xff]  ;;  %v40_v24 = vld [vmem:[%s1143_s2 + $0x88] sm:$0xff]  ;;  %v42_v25 = vld [vmem:[%s1143_s2 + $0x98] sm:$0xff] }
   0x7   :  { %v693_v26 = vpack.c.bf16 %v37_v23, %v35_v22  ;;  %v695_v27 = vpack.c.bf16 %v42_v25, %v40_v24  ;;  %v39_v28 = vld [vmem:[%s1143_s2 + $0x80] sm:$0xff]  ;;  %v41_v29 = vld [vmem:[%s1143_s2 + $0x90] sm:$0xff]  ;;  %v44_v30 = vld [vmem:[%s1143_s2 + $0xa8] sm:$0xff] }
   0x8   :  { %v46_v31 = vld [vmem:[%s1143_s2 + $0xb8] sm:$0xff]  ;;  %v906_v32 = vld.sshfl [vmem:[%s1141_s0] sm:$0x33 pattern:$0x76325410]  ;;  %v697_v33 = vpack.c.bf16 %v41_v29, %v39_v28  ;;  %v178_v35 = vld [vmem:[%s1143_s2 + $0x170] sm:$0xff] }
   0x9   :  { %686 = vmatpush1.bf16.msra.mxu0 %v685_v14  ;;  %v89_v34 = vcombine.high %v906_v32, %v906_v32  ;;  %v179_v36 = vld [vmem:[%s1143_s2 + $0x180] sm:$0xff]  ;;  %v180_v37 = vld [vmem:[%s1143_s2 + $0x190] sm:$0xff]  ;;  %v699_v38 = vpack.c.bf16 %v46_v31, %v44_v30  ;;  %v48_v43 = vld [vmem:[%s1143_s2 + $0xc8] sm:$0xff] }
   0xa   :  { %688 = vmatprep.subr.bf16.mxu0 %v687_v15  ;;  %v43_v39 = vld [vmem:[%s1143_s2 + $0xa0] sm:$0xff]  ;;  %v45_v40 = vld [vmem:[%s1143_s2 + $0xb0] sm:$0xff]  ;;  %v724_v41 = vpack.c.bf16 %v179_v36, %v178_v35  ;;  %v50_v44 = vld [vmem:[%s1143_s2 + $0xd8] sm:$0xff] }
   0xb   :  { %v181_v42 = vld [vmem:[%s1143_s2 + $0x1a0] sm:$0xff]  ;;  %620 = vmatprep.mubr.msk.f32.mxu0 %vm91_vm0, %v89_v34  ;;  %v701_v46 = vpack.c.bf16 %v45_v40, %v43_v39  ;;  %v182_v47 = vld [vmem:[%s1143_s2 + $0x1b0] sm:$0xff]  ;;  %v703_v49 = vpack.c.bf16 %v50_v44, %v48_v43  ;;  %v52_v52 = vld [vmem:[%s1143_s2 + $0xe8] sm:$0xff] }
   0xc   :  { %725 = vmatpush1.bf16.msra.mxu1 %v724_v41  ;;  %v727_v45 = vpack.c.bf16 %v181_v42, %v180_v37  ;;  %v183_v48 = vld [vmem:[%s1143_s2 + $0x1c0] sm:$0xff]  ;;  %v49_v51 = vld [vmem:[%s1143_s2 + $0xd0] sm:$0xff]  ;;  %v54_v53 = vld [vmem:[%s1143_s2 + $0xf8] sm:$0xff] }
   0xd   :  { %690 = vmatpush1.bf16.msra.mxu0 %v689_v20  ;;  %726 = vmatprep.subr.bf16.mxu1 %v802_v7  ;;  %v47_v50 = vld [vmem:[%s1143_s2 + $0xc0] sm:$0xff]  ;;  %v730_v54 = vpack.c.bf16 %v183_v48, %v182_v47 }
   0xe   :  { %692 = vmatprep.subr.bf16.mxu0 %v691_v21 }
  0x10   :  { %728 = vmatpush1.bf16.msra.mxu1 %v727_v45 }
  0x11   :  { %694 = vmatpush1.bf16.msra.mxu0 %v693_v26 }
  0x12   :  { %696 = vmatprep.subr.bf16.mxu0 %v695_v27 }
  0x15   :  { %698 = vmatpush1.bf16.msra.mxu0 %v697_v33 }
  0x16   :  { %700 = vmatprep.subr.bf16.mxu0 %v699_v38 }
  0x17   :  { %10 = vsyncpa [#allocation3], 0  ;;  %v705_v55 = vpack.c.bf16 %v49_v51, %v47_v50  ;;  %729 = vmatprep.subr.bf16.mxu1 %v802_v7  ;;  %v184_v56 = vld [vmem:[%s1143_s2 + $0x1d0] sm:$0xff]  ;;  %v185_v57 = vld [vmem:[%s1143_s2 + $0x1e0] sm:$0xff]  ;;  %v707_v58 = vpack.c.bf16 %v54_v53, %v52_v52  ;;  %vm94_vm1 = vcmask 1043456   ;;  %v71_v44 = vlaneseq  ;;  %s805_s13 = smov [#allocation2]  }
  0x18   :  { %v51_v59 = vld [vmem:[%s1143_s2 + $0xe0] sm:$0xff]  ;;  %v53_v60 = vld [vmem:[%s1143_s2 + $0xf0] sm:$0xff]  ;;  %v56_v61 = vld [vmem:[%s1143_s2 + $0x108] sm:$0xff]  ;;  %731 = vmatpush1.bf16.msra.mxu1 %v730_v54  ;;  %v733_v63 = vpack.c.bf16 %v185_v57, %v184_v56  ;;  %vm203_vm3 = vcmask 523264   ;;  %vm288_vm5 = vcmask 1044480   ;;  %vm804_vm6 = vmmov 0  }
  0x19   :  { %702 = vmatpush1.bf16.msra.mxu0 %v701_v46  ;;  %v58_v62 = vld [vmem:[%s1143_s2 + $0x118] sm:$0xff]  ;;  %v709_v0 = vpack.c.bf16 %v53_v60, %v51_v59  ;;  %732 = vmatprep.subr.bf16.mxu1 %v802_v7  ;;  %v186_v1 = vld [vmem:[%s1143_s2 + $0x1f0] sm:$0xff]  ;;  %v187_v2 = vld [vmem:[%s1143_s2 + $0x200] sm:$0xff]  ;;  %v72_v45 = vshrl.u32 %v71_v44, 7  ;;  %vm284_vm7 = vcmask 39936   ;;  %vm362_vm9 = vcmask 195584  }
  0x1a   :  { %704 = vmatprep.subr.bf16.mxu0 %v703_v49  ;;  %v711_v3 = vpack.c.bf16 %v58_v62, %v56_v61  ;;  %v55_v4 = vld [vmem:[%s1143_s2 + $0x100] sm:$0xff]  ;;  %v57_v5 = vld [vmem:[%s1143_s2 + $0x110] sm:$0xff]  ;;  %v60_v6 = vld [vmem:[%s1143_s2 + $0x128] sm:$0xff]  ;;  %v736_v9 = vpack.c.bf16 %v187_v2, %v186_v1  ;;  %v803_v62 = vmov 0.0   ;;  %vm446_vm11 = vcmask 261120   ;;  %s609_s14 = sshll.u32 %s805_s13, 4  ;;  %s610_s14 = int_to_ptr.vmem [resolvable:$true] %s609_s14 }
  0x1b   :  { %v62_v8 = vld [vmem:[%s1143_s2 + $0x138] sm:$0xff]  ;;  %v713_v10 = vpack.c.bf16 %v57_v5, %v55_v4  ;;  %v188_v11 = vld [vmem:[%s1143_s2 + $0x210] sm:$0xff]  ;;  %v189_v12 = vld [vmem:[%s1143_s2 + $0x220] sm:$0xff]  ;;  %v73_v46 = vsub.s32 0, %v72_v45  ;;  %v77_v48 = vsub.s32 1, %v72_v45  ;;  %vm601_vm13 = vcmask 41984   ;;  %p783_p1 = scmp.lt.s32.totalorder %s610_s14, %s610_s14 }
  0x1c   :  { %734 = vmatpush1.bf16.msra.mxu1 %v733_v63  ;;  %v715_v13 = vpack.c.bf16 %v62_v8, %v60_v6  ;;  %v59_v14 = vld [vmem:[%s1143_s2 + $0x120] sm:$0xff]  ;;  %v61_v15 = vld [vmem:[%s1143_s2 + $0x130] sm:$0xff]  ;;  %v64_v16 = vld [vmem:[%s1143_s2 + $0x148] sm:$0xff]  ;;  %v739_v18 = vpack.c.bf16 %v189_v12, %v188_v11 }
  0x1d   :  { %706 = vmatpush1.bf16.msra.mxu0 %v705_v55  ;;  %735 = vmatprep.subr.bf16.mxu1 %v802_v7  ;;  %v66_v17 = vld [vmem:[%s1143_s2 + $0x158] sm:$0xff]  ;;  %v717_v19 = vpack.c.bf16 %v61_v15, %v59_v14  ;;  %v190_v20 = vld [vmem:[%s1143_s2 + $0x230] sm:$0xff]  ;;  %v191_v21 = vld [vmem:[%s1143_s2 + $0x240] sm:$0xff] }
  0x1e   :  { %708 = vmatprep.subr.bf16.mxu0 %v707_v58  ;;  %v719_v22 = vpack.c.bf16 %v66_v17, %v64_v16  ;;  %v63_v23 = vld [vmem:[%s1143_s2 + $0x140] sm:$0xff]  ;;  %v65_v24 = vld [vmem:[%s1143_s2 + $0x150] sm:$0xff]  ;;  %v742_v25 = vpack.c.bf16 %v191_v21, %v190_v20  ;;  %v68_v29 = vld [vmem:[%s1143_s2 + $0x168] sm:$0xf] }
  0x1f   :  { %v721_v26 = vpack.c.bf16 %v65_v24, %v63_v23  ;;  %v192_v27 = vld [vmem:[%s1143_s2 + $0x250] sm:$0xff]  ;;  %v193_v28 = vld [vmem:[%s1143_s2 + $0x260] sm:$0xff]  ;;  %v281_v60 = vld [vmem:[%s1144_s3 + $0x8] sm:$0xff] }
  0x20   :  { %737 = vmatpush1.bf16.msra.mxu1 %v736_v9  ;;  %v745_v30 = vpack.c.bf16 %v193_v28, %v192_v27  ;;  %v194_v31 = vld [vmem:[%s1143_s2 + $0x270] sm:$0xff]  ;;  %v195_v33 = vld [vmem:[%s1143_s2 + $0x280] sm:$0xff]  ;;  %v283_v63 = vld [vmem:[%s1144_s3 + $0x18] sm:$0x1f] }
  0x21   :  { %710 = vmatpush1.bf16.msra.mxu0 %v709_v0  ;;  %738 = vmatprep.subr.bf16.mxu1 %v802_v7  ;;  %v67_v34 = vld [vmem:[%s1143_s2 + $0x160] sm:$0xf]  ;;  %v748_v35 = vpack.c.bf16 %v195_v33, %v194_v31  ;;  %v196_v36 = vld [vmem:[%s1143_s2 + $0x290] sm:$0xff]  ;;  %v444_v15 = vld [vmem:[%s1144_s3 + $0x38] sm:$0xff] }
  0x22   :  { %712 = vmatprep.subr.bf16.mxu0 %v711_v3  ;;  %v197_v37 = vld [vmem:[%s1143_s2 + $0x2a0] sm:$0xff]  ;;  %v198_v39 = vld [vmem:[%s1143_s2 + $0x2b0] sm:$0xff] }
  0x23   :  { %v751_v38 = vpack.c.bf16 %v197_v37, %v196_v36  ;;  %v199_v40 = vld [vmem:[%s1143_s2 + $0x2c0] sm:$0xff]  ;;  %v282_v0 = vld [vmem:[%s1144_s3 + $0x10] sm:$0xff] }
  0x24   :  { %740 = vmatpush1.bf16.msra.mxu1 %v739_v18  ;;  %v754_v41 = vpack.c.bf16 %v199_v40, %v198_v39  ;;  %v201_v42 = vld [vmem:[%s1143_s2 + $0x2e0] sm:$0xff]  ;;  %v443_v14 = vld [vmem:[%s1144_s3 + $0x30] sm:$0xff]  ;;  %v524_v18 = vld [vmem:[%s1144_s3 + $0x48] sm:$0xff] }
  0x25   :  { %714 = vmatpush1.bf16.msra.mxu0 %v713_v10  ;;  %741 = vmatprep.subr.bf16.mxu1 %v802_v7  ;;  %v69_v47 = vld [vmem:[%s1145_s4] ss:$8 sm:$0x3]  ;;  %v202_v2 = vld [vmem:[%s1145_s4 + $0x1] ss:$0 sm:$0xff]  ;;  %v766_v16 = vpack.c.bf16 %v444_v15, %v443_v14  ;;  %v525_v27 = vld [vmem:[%s1144_s3 + $0x50] sm:$0xff] }
  0x26   :  { %716 = vmatprep.subr.bf16.mxu0 %v715_v13  ;;  %v74_v49 = vrot.slane %v69_v47, %v73_v46  ;;  %v78_v50 = vrot.slane %v69_v47, %v77_v48  ;;  %v280_v59 = vld [vmem:[%s1144_s3] sm:$0xff]  ;;  %v442_v10 = vld [vmem:[%s1144_s3 + $0x28] sm:$0xff] }
  0x27   :  { %v760_v61 = vpack.c.bf16 %v281_v60, %v280_v59  ;;  %v22_v1 = vld [vmem:[%s1142_s1] sm:$0x3]  ;;  %v436_v21 = vld [vmem:[%s1145_s4 + $0x2] ss:$0 sm:$0xff]  ;;  %v527_v36 = vld [vmem:[%s1145_s4 + $0x4] ss:$0 sm:$0xff] }
  0x28   :  { %743 = vmatpush1.bf16.msra.mxu1 %v742_v25  ;;  %v441_v9 = vld [vmem:[%s1144_s3 + $0x20] sm:$0xff] }
  0x29   :  { %718 = vmatpush1.bf16.msra.mxu0 %v717_v19  ;;  %744 = vmatprep.subr.bf16.mxu1 %v802_v7  ;;  %v763_v12 = vpack.c.bf16 %v442_v10, %v441_v9  ;;  %v523_v17 = vld [vmem:[%s1144_s3 + $0x40] sm:$0xff] }
  0x2a   :  { %720 = vmatprep.subr.bf16.mxu0 %v719_v22  ;;  %v769_v19 = vpack.c.bf16 %v524_v18, %v523_v17 }
  0x2c   :  { %746 = vmatpush1.bf16.msra.mxu1 %v745_v30 }
  0x2d   :  { %722 = vmatpush1.bf16.msra.mxu0 %v721_v26  ;;  %747 = vmatprep.subr.bf16.mxu1 %v802_v7 }
  0x2e   :  { %618 = vmatprep.subr.msk.mxu0 %vm94_vm1, %v68_v29  ;;  %v445_v29 = vld [vmem:[%s1145_s4 + $0x3] ss:$0 sm:$0xff] }
  0x30   :  { %749 = vmatpush1.bf16.msra.mxu1 %v748_v35 }
  0x31   :  { %619 = vmatpush1.msk.msra.mxu0 %vm94_vm1, %v67_v34  ;;  %750 = vmatprep.subr.bf16.mxu1 %v802_v7 }
  0x32   :  { %166 = vmatmul.mubr.f32.vlgmr.msra.gmra.mrb[0].mxu0 %v906_v32  ;;  %v200_v32 = vld [vmem:[%s1143_s2 + $0x2d0] sm:$0xff]  ;;  %643 = vmatprep.subr.mxu0 %v803_v62 }
  0x33   :  { %v757_v43 = vpack.c.bf16 %v201_v42, %v200_v32  ;;  %644 = vmatpush3.msk.msra.mxu0 %vm288_vm5, %v283_v63  ;;  %645 = vmatprep.mubr.msk.f32.mxu0 %vm804_vm6, %v803_v62 }
  0x34   :  { %752 = vmatpush1.bf16.msra.mxu1 %v751_v38  ;;  %762 = vmatprep.subr.bf16.mxu0 %v802_v7 }
  0x35   :  { %753 = vmatprep.subr.bf16.mxu1 %v802_v7 }
  0x36   :  { %646 = vmatmul.mubr.msk.f32.vlgmr.msra.gmra.mrb[2].mxu0 %vm284_vm7, %v22_v1 }
  0x37   :  { %665 = vmatprep.mubr.msk.f32.mxu0 %vm804_vm6, %v803_v62  ;;  %764 = vmatpush3.bf16.msra.mxu0 %v763_v12 }
  0x38   :  { %755 = vmatpush1.bf16.msra.mxu1 %v754_v41  ;;  %765 = vmatprep.subr.bf16.mxu0 %v802_v7 }
  0x39   :  { %756 = vmatprep.subr.bf16.mxu1 %v802_v7 }
  0x3b   :  { %767 = vmatpush3.bf16.msra.mxu0 %v766_v16 }
  0x3c   :  { %758 = vmatpush1.bf16.msra.mxu1 %v757_v43 }
  0x3d   :  { %759 = vmatprep.subr.bf16.mxu1 %v802_v7 }
 0x105   :  { %v167_v51 = vpop.f32.mrb[0].mxu0 }
 0x106   :  { %v168_v52 = vadd.f32 %v167_v51, %v74_v49  ;;  %v169_v53 = vpop.f32.mrb[1].mxu0 }
 0x107   :  { %v170_v54 = vadd.f32 %v169_v53, %v78_v50 }
 0x108   :  { %v174_v55 = vmul.f32 0.01, %v168_v52  ;;  %vm172_vm4 = vcmp.ge.f32.partialorder %v168_v52, 0.0 }
 0x109   :  { %vm173_vm2 = vcmp.ge.f32.partialorder %v170_v54, 0.0  ;;  %v175_v56 = vmul.f32 0.01, %v170_v54  ;;  %v358_v11 = vpop.f32.mrb[2].mxu0 }
 0x10a   :  { %v176_v58 = vsel %vm172_vm4, %v168_v52, %v174_v55  ;;  %v647_v13 = vpop.f32.mrb[3].mxu0 }
 0x10b   :  { %v177_v57 = vsel %vm173_vm2, %v170_v54, %v175_v56 }
 0x10c   :  { %621 = vmatprep.mubr.msk.f32.mxu1 %vm203_vm3, %v177_v57 }
 0x10d   :  { %272 = vmatmul.mubr.f32.vlgmr.msra.gmra.mrb[0].mxu1 %v176_v58 }
 0x10e   :  { %761 = vmatpush3.bf16.msra.mxu1 %v760_v61  ;;  %654 = vmatprep.mubr.msk.f32.mxu1 %vm804_vm6, %v803_v62 }
 0x10f   :  { %652 = vmatprep.subr.mxu1 %v803_v62 }
 0x112   :  { %653 = vmatpush3.msra.mxu1 %v282_v0 }
 0x113   :  { %768 = vmatprep.subr.bf16.mxu1 %v802_v7 }
 0x1e0   :  { %v273_v3 = vpop.f32.mrb[0].mxu1 }
 0x1e1   :  { %v274_v4 = vadd.f32 %v273_v3, %v202_v2  ;;  %v275_v5 = vpop.f32.mrb[1].mxu1 }
 0x1e3   :  { %vm277_vm8 = vcmp.ge.f32.partialorder %v274_v4, 0.0  ;;  %v278_v6 = vmul.f32 0.01, %v274_v4 }
 0x1e5   :  { %v279_v8 = vsel %vm277_vm8, %v274_v4, %v278_v6 }
 0x1e6   :  { %655 = vmatmul.mubr.msk.f32.vlgmr.msra.gmra.mrb[2].mxu1 %vm362_vm9, %v279_v8 }
 0x1e7   :  { %676 = vmatprep.mubr.msk.f32.mxu1 %vm804_vm6, %v803_v62  ;;  %770 = vmatpush3.bf16.msra.mxu1 %v769_v19 }
 0x1e8   :  { %771 = vmatprep.subr.bf16.mxu1 %v802_v7  ;;  %v526_v7 = vld [vmem:[%s1144_s3 + $0x58] sm:$0xff]  ;;  %s778_s3 = scalar_lea.vmem %s610_s14, 32 }
 0x1e9   :  { %v772_v28 = vpack.c.bf16 %v526_v7, %v525_v27  ;;  %p779_p0 = scmp.ne.s32.totalorder %s610_s14, %s778_s3  ;;  %p784_p2 = scmp.lt.s32.totalorder %s778_s3, %s778_s3 }
 0x1eb   :  { %773 = vmatpush3.bf16.msra.mxu1 %v772_v28  ;;  %p785_p3 = por %p784_p2, %p783_p1 }
 0x1ed   :  { %p786_p4 = pnand %p785_p3, %p779_p0 }
 0x2b9   :  { %v432_v20 = vpop.f32.mrb[2].mxu1 }
 0x2ba   :  { %v433_v22 = vadd.f32 %v432_v20, %v358_v11  ;;  %v656_v23 = vpop.f32.mrb[3].mxu1 }
 0x2bc   :  { %v437_v24 = vadd.f32 %v436_v21, %v433_v22 }
 0x2be   :  { %vm438_vm10 = vcmp.ge.f32.partialorder %v437_v24, 0.0  ;;  %v439_v25 = vmul.f32 0.01, %v437_v24 }
 0x2c0   :  { %v440_v26 = vsel %vm438_vm10, %v437_v24, %v439_v25 }
 0x2c1   :  { %666 = vmatmul.mubr.msk.f32.vlgmr.msra.gmra.mrb[4].mxu0 %vm446_vm11, %v440_v26 }
 0x394   :  { %v516_v30 = vpop.f32.mrb[4].mxu0 }
 0x395   :  { %v517_v31 = vadd.f32 %v516_v30, %v445_v29  ;;  %v667_v33 = vpop.f32.mrb[5].mxu0 }
 0x397   :  { %vm520_vm12 = vcmp.ge.f32.partialorder %v517_v31, 0.0  ;;  %v521_v34 = vmul.f32 0.01, %v517_v31 }
 0x399   :  { %v522_v35 = vsel %vm520_vm12, %v517_v31, %v521_v34 }
 0x39a   :  { %677 = vmatmul.mubr.msk.f32.vlgmr.msra.gmra.mrb[4].mxu1 %vm446_vm11, %v522_v35 }
 0x46d   :  { %v597_v37 = vpop.f32.mrb[4].mxu1 }
 0x46e   :  { %v598_v38 = vadd.f32 %v597_v37, %v527_v36  ;;  %v678_v39 = vpop.f32.mrb[5].mxu1 }
 0x470   :  { %602 = vst.msk [vmem:[#allocation2] sm:$0x3] %vm601_vm13, %v598_v38 }
 0x471   :  { %789 = shalt.err (!%p786_p4)
}
 0x472   :  { %s790_s17 = scalar_lea.hbm %s1146_s5, 32 }
 0x473   :  { %p791_p5 = scmp.ne.s32.totalorder %s1146_s5, %s790_s17  ;;  %p794_p6 = scmp.lt.u32.totalorder %s790_s17, %s1146_s5 }
 0x475   :  { %p796_p7 = pnand %p794_p6, %p791_p5 }
 0x477   :  { %799 = shalt.err (!%p796_p7)
}
 0x478   :  { %612 = dma.vmem_to_hbm [thread:$0]  %s610_s14, 32, %s1146_s5, [#allocation3]  }
 0x479   :  { %800 = dma.done.wait [#allocation3], 32  }
 0x47a   :  { %801 = vsyncadd [#allocation3], 4294967264 }
 0x47b   :  { %616 = vsyncpa [#allocation3], 1 }

</bundles_post_ra>
